<compile_context>
chip_gen: v7x
topology: tpu7x:2x2x1
jax: 0.10.0
libtpu: 0.0.40
codegen_flags: <defaults>
</compile_context>

<pallas_src>
import functools

import jax
import jax.numpy as jnp
from jax.experimental import pallas as pl
from jax.experimental.pallas import tpu as pltpu


_MAX_BLOCK_BYTES = 4 * 1024 * 1024     # per-block budget; x4 buffers when pipelined
_MIN_BLOCK_BYTES = 512 * 1024          # below this, grid-step overhead dominates
_VMEM_LIMIT_BYTES = 32 * 1024 * 1024   # safe on v5e/v6e (128 MiB) and v7x (64 MiB)


def _identity_kernel(x_ref, o_ref):
    # Elementwise copy of the current VMEM tile.
    o_ref[...] = x_ref[...]


def _sublane(dtype) -> int:
    """Native packed-sublane count for the dtype (rows per vreg)."""
    return {4: 8, 2: 16, 1: 32}.get(jnp.dtype(dtype).itemsize, 8)


def _choose_layout(total: int, itemsize: int, sublane: int):
    """Pick (R, C, tile_rows, padded_total) for a flat copy of `total` elements.

    C is a multiple of 128 (lane-dense); tile_rows divides R and is either a
    multiple of `sublane` or equal to R (full-extent block); the tile stays
    within _MAX_BLOCK_BYTES.  padded_total >= total; padding is only used when
    no clean factorization exists (and is bounded by ~12.5% / one tile).
    """
    # 1) Padding-free factorization: C | total with C a multiple of 128.
    if total % 128 == 0:
        for c in (4096, 2048, 1024, 512, 256, 128):
            if total % c:
                continue
            r = total // c
            row_bytes = c * itemsize
            if r * row_bytes <= _MAX_BLOCK_BYTES:
                # Whole array fits in one block (full-extent: no divisibility
                # constraint, single DMA in / single DMA out).
                return r, c, r, total
            if r % sublane:
                continue
            # Largest tile-row count that divides r, is a multiple of the
            # packed-sublane count, and fits the per-block budget.
            max_tr = max(sublane, (_MAX_BLOCK_BYTES // row_bytes) // sublane * sublane)
            tr = sublane
            d = sublane
            while d <= max_tr:
                if r % d == 0:
                    tr = d
                d += sublane
            if tr * row_bytes >= _MIN_BLOCK_BYTES:
                return r, c, tr, total
            # else: only degenerate tiny tiles divide evenly -> padded path.
    # 2) Padded fallback: flat-pad to a multiple of (tile_rows * 128), C = 128.
    c = 128
    row_bytes = c * itemsize
    # Target ~1/8 of the array per block (capped) so padding overhead stays
    # <= ~12.5% while keeping the grid short.
    tgt_bytes = min(_MAX_BLOCK_BYTES, max(sublane * row_bytes, (total * itemsize) // 8))
    tr = max(sublane, (tgt_bytes // row_bytes) // sublane * sublane)
    chunk = tr * c
    padded_total = ((total + chunk - 1) // chunk) * chunk
    return padded_total // c, c, tr, padded_total


def _copy_2d(x2: jax.Array, tile_rows: int) -> jax.Array:
    """Tiled HBM->HBM copy of a 2D array via VMEM, output aliased to input."""
    rows, cols = x2.shape
    return pl.pallas_call(
        _identity_kernel,
        out_shape=jax.ShapeDtypeStruct((rows, cols), x2.dtype),
        grid_spec=pltpu.PrefetchScalarGridSpec(
            num_scalar_prefetch=0,
            grid=(rows // tile_rows,),
            in_specs=[pl.BlockSpec((tile_rows, cols), lambda i: (i, 0))],
            out_specs=pl.BlockSpec((tile_rows, cols), lambda i: (i, 0)),
        ),
        input_output_aliases={0: 0},  # reuse the operand's HBM buffer when possible
        compiler_params=pltpu.CompilerParams(
            dimension_semantics=("parallel",),
            vmem_limit_bytes=_VMEM_LIMIT_BYTES,
        ),
    )(x2)


@jax.jit
def identity(x: jax.Array) -> jax.Array:
    """Pallas identity: returns an array equal to x (same shape & dtype)."""
    orig_shape = x.shape
    total = x.size
    if total == 0:
        return x  # nothing to copy; a Pallas grid can't cover an empty array

    itemsize = jnp.dtype(x.dtype).itemsize
    sublane = _sublane(x.dtype)
    rows, cols, tile_rows, padded_total = _choose_layout(total, itemsize, sublane)

    flat = x.reshape(-1)
    if padded_total != total:
        flat = jnp.pad(flat, (0, padded_total - total))

    out = _copy_2d(flat.reshape(rows, cols), tile_rows)

    out = out.reshape(-1)
    if padded_total != total:
        out = out[:total]
    return out.reshape(orig_shape)


if __name__ == "__main__":
    key = jax.random.PRNGKey(0)
    x = jax.random.normal(key, (2, 4, 16, 16), dtype=jnp.float32)  # NCHW

    y = identity(x)
    jax.block_until_ready(y)

    assert y.shape == x.shape, (y.shape, x.shape)
    assert y.dtype == x.dtype, (y.dtype, x.dtype)
    assert bool(jnp.all(y == x)), "identity output mismatch"

    print("KERNEL_OK")
</pallas_src>

<mosaic_0001>
module attributes {stable_mosaic.version = 11 : i64} {
  func.func @_identity_kernel(%arg0: i32, %arg1: memref<1x2048xf32, #tpu.memory_space<vmem>>, %arg2: memref<1x2048xf32, #tpu.memory_space<vmem>>) attributes {dimension_semantics = [#tpu.dimension_semantics<parallel>], iteration_bounds = array<i64: 1>, scalar_prefetch = 0 : i64, scratch_operands = 0 : i64, tpu.core_type = #tpu.core_type<tc>, window_params = [{transform_indices = @transform_0, window_bounds = array<i64: 1, 2048>}, {transform_indices = @transform_1, window_bounds = array<i64: 1, 2048>}]} {
    %c0 = arith.constant 0 : index
    %c0_0 = arith.constant 0 : index
    %0 = vector.load %arg1[%c0, %c0_0] : memref<1x2048xf32, #tpu.memory_space<vmem>>, vector<1x2048xf32>
    %c0_1 = arith.constant 0 : index
    %c0_2 = arith.constant 0 : index
    %1 = vector.load %arg2[%c0_1, %c0_2] : memref<1x2048xf32, #tpu.memory_space<vmem>>, vector<1x2048xf32>
    tpu.vector_store %arg2[%c0_1, %c0_2], %0 {strides = array<i32>} : memref<1x2048xf32, #tpu.memory_space<vmem>>, vector<1x2048xf32>,
    return
  }
  func.func @transform_0(%arg0: i32) -> (i32, i32) {
    %c0_i32 = arith.constant 0 : i32
    %c0_i32_0 = arith.constant 0 : i32
    return %arg0, %c0_i32 : i32, i32
  }
  func.func @transform_1(%arg0: i32) -> (i32, i32) {
    %c0_i32 = arith.constant 0 : i32
    %c0_i32_0 = arith.constant 0 : i32
    return %arg0, %c0_i32 : i32, i32
  }
}

</mosaic_0001>

<bundles_post_ra>
// kernel: identity.1
= control target key start
LH: loop header
LB: loop body
LE: loop exit
PB: predicated region body
PF: predicated region fallthrough
CT: control target
= control target key end

     0   :  { %s38_s0 = inlined_call_operand.vmem [shape: f32[1,2048], index: 0, kind: input, shape index: {}, may-alias: {0,1}]   ;;  %s39_s1 = inlined_call_operand.vmem [shape: f32[1,2048], index: 1, kind: output, shape index: {}, may-alias: {0,1}]  }
   0x1   :  { %v8_v0 = vld [vmem:[%s38_s0] sm:$0xff]  ;;  %v9_v1 = vld [vmem:[%s38_s0 + $0x8] sm:$0xff] }
   0x2   :  { %10 = vst [vmem:[%s39_s1] sm:$0xff] %v8_v0  ;;  %11 = vst [vmem:[%s39_s1 + $0x8] sm:$0xff] %v9_v1 }

</bundles_post_ra>
